<compile_context>
chip_gen: v7x
topology: tpu7x:2x2x1
jax: 0.10.0
libtpu: 0.0.40
codegen_flags: <defaults>
</compile_context>

<pallas_src>
import jax
import jax.numpy as jnp
from jax.experimental import pallas as pl
from jax.experimental.pallas import tpu as pltpu


def _round_up(x, m):
    return (x + m - 1) // m * m


def _pick_vmem_limit_bytes():
    """Generation-aware scoped-VMEM limit: ~3/4 of physical, capped at 96 MiB."""
    try:
        cap = int(pltpu.get_tpu_info().vmem_capacity_bytes)
        return int(min(cap * 3 // 4, 96 * 1024 * 1024))
    except Exception:
        # Safe everywhere (v7x physical VMEM is 64 MiB; v5e/v6e have 128 MiB).
        return 48 * 1024 * 1024


def mlp_head_kernel(x_ref, w1_ref, b1_ref, w2_ref, b2_ref, out_ref):
    """Fused fc1 + bias + ReLU + fc2 + bias on one (tile_m, ...) row tile.

    x_ref:  (tile_m, Din_p)   f32 or bf16 (cast to bf16 in-kernel)
    w1_ref: (Din_p, Dh_p)     bf16 (VMEM-resident, single-buffered)
    b1_ref: (1, Dh_p)         f32
    w2_ref: (Dh_p, Dout_p)    bf16 (VMEM-resident, single-buffered)
    b2_ref: (1, Dout_p)       f32
    out_ref:(tile_m, Dout_p)  out dtype
    """
    x = x_ref[...].astype(jnp.bfloat16)
    # fc1: MXU matmul with f32 accumulation, bias + ReLU on the VPU.
    h = jnp.dot(x, w1_ref[...], preferred_element_type=jnp.float32)
    h = jnp.maximum(h + b1_ref[...], 0.0)
    # fc2: hidden activation feeds the second MXU matmul directly (no VMEM
    # scratch round-trip between the two matmuls).
    y = jnp.dot(h.astype(jnp.bfloat16), w2_ref[...],
                preferred_element_type=jnp.float32)
    out_ref[...] = (y + b2_ref[...]).astype(out_ref.dtype)


def prepare_simclr_head_params(fc1_w, fc1_b, fc2_w, fc2_b):
    """One-time weight prep: PyTorch (out,in) -> (in,out), pad to lane multiples,
    cast to bf16 (biases stay f32).  Do this once, not per forward call."""
    Dh, Din = fc1_w.shape
    Dout, Dh2 = fc2_w.shape
    assert Dh == Dh2, (Dh, Dh2)
    Din_p, Dh_p, Dout_p = (_round_up(d, 128) for d in (Din, Dh, Dout))

    w1 = jnp.zeros((Din_p, Dh_p), jnp.bfloat16).at[:Din, :Dh].set(
        fc1_w.T.astype(jnp.bfloat16))
    w2 = jnp.zeros((Dh_p, Dout_p), jnp.bfloat16).at[:Dh, :Dout].set(
        fc2_w.T.astype(jnp.bfloat16))
    b1 = jnp.zeros((1, Dh_p), jnp.float32).at[0, :Dh].set(
        fc1_b.astype(jnp.float32))
    b2 = jnp.zeros((1, Dout_p), jnp.float32).at[0, :Dout].set(
        fc2_b.astype(jnp.float32))
    return {"w1": w1, "b1": b1, "w2": w2, "b2": b2, "dims": (Din, Dh, Dout)}


def simclr_projection_head_prepared(x, params, *, tile_m=256,
                                    out_dtype=jnp.float32):
    """Forward pass using pre-prepared (padded/transposed/bf16) parameters.

    x: (B, Din).  Returns (B, Dout) in `out_dtype`.
    """
    w1, b1, w2, b2 = params["w1"], params["b1"], params["w2"], params["b2"]
    Din, Dh, Dout = params["dims"]
    Din_p, Dh_p = w1.shape
    Dout_p = w2.shape[1]

    B, Din_x = x.shape
    assert Din_x == Din, (Din_x, Din)
    assert tile_m % 8 == 0, "row tile must be a sublane multiple"

    # --- Row tiling: keep tiles big for MXU fill, but guarantee >= 2 grid
    # steps (when B allows) so the "parallel" axis actually feeds both of
    # v7x's TensorCores.  No effect on single-TC v5e/v6e.
    tile_m = _round_up(min(tile_m, _round_up(B, 8)), 8)
    n_tiles = -(-_round_up(B, 8) // tile_m)
    if n_tiles < 2 and B > 8:
        tile_m = _round_up(-(-B // 2), 8)
    B_p = _round_up(B, tile_m)
    grid = (B_p // tile_m,)

    # --- x staging: skip the pad/copy pass entirely in the aligned case; the
    # f32->bf16 cast happens in-kernel so x is read from HBM exactly once.
    if B_p == B and Din_p == Din:
        xp = x
    else:
        xp = jnp.zeros((B_p, Din_p), jnp.bfloat16).at[:B, :Din].set(
            x.astype(jnp.bfloat16))

    def _run(single_buffer_weights):
        if single_buffer_weights:
            def inv(shape):
                return pl.BlockSpec(shape, lambda i: (0, 0),
                                    pipeline_mode=pl.Buffered(1))
        else:
            def inv(shape):
                return pl.BlockSpec(shape, lambda i: (0, 0))

        return pl.pallas_call(
            mlp_head_kernel,
            out_shape=jax.ShapeDtypeStruct((B_p, Dout_p), out_dtype),
            grid_spec=pltpu.PrefetchScalarGridSpec(
                num_scalar_prefetch=0,
                grid=grid,
                in_specs=[
                    pl.BlockSpec((tile_m, Din_p), lambda i: (i, 0)),  # x (streamed)
                    inv((Din_p, Dh_p)),                               # W1 (resident)
                    inv((1, Dh_p)),                                   # b1
                    inv((Dh_p, Dout_p)),                              # W2 (resident)
                    inv((1, Dout_p)),                                 # b2
                ],
                out_specs=pl.BlockSpec((tile_m, Dout_p), lambda i: (i, 0)),
            ),
            compiler_params=pltpu.CompilerParams(
                dimension_semantics=("parallel",),   # megacore row split on v7x
                vmem_limit_bytes=_pick_vmem_limit_bytes(),
            ),
        )(xp, w1, b1, w2, b2)

    try:
        out = _run(single_buffer_weights=True)
    except Exception:
        # Older/newer JAX without BlockSpec(pipeline_mode=...): fall back to
        # default double-buffering (correct, just uses more VMEM).
        out = _run(single_buffer_weights=False)

    # Strip batch/feature padding (padded rows/cols are sliced off here).
    return out[:B, :Dout]


def simclr_projection_head(x, fc1_w, fc1_b, fc2_w, fc2_b, *, tile_m=256,
                           out_dtype=jnp.float32):
    """Convenience one-shot wrapper (prep + forward).  For repeated calls,
    prepare_simclr_head_params() once and use simclr_projection_head_prepared."""
    params = prepare_simclr_head_params(fc1_w, fc1_b, fc2_w, fc2_b)
    return simclr_projection_head_prepared(x, params, tile_m=tile_m,
                                           out_dtype=out_dtype)


def simclr_head_ref_f32(x, fc1_w, fc1_b, fc2_w, fc2_b):
    """Pure-f32 JAX reference matching the PyTorch forward."""
    h = jnp.maximum(x @ fc1_w.T + fc1_b, 0.0)
    return h @ fc2_w.T + fc2_b


def simclr_head_ref_matched(x, fc1_w, fc1_b, fc2_w, fc2_b):
    """Reference with the same bf16-in / f32-accumulate numerics as the kernel."""
    xb = x.astype(jnp.bfloat16)
    w1b = fc1_w.T.astype(jnp.bfloat16)
    w2b = fc2_w.T.astype(jnp.bfloat16)
    h = jnp.dot(xb, w1b, preferred_element_type=jnp.float32) + fc1_b
    h = jnp.maximum(h, 0.0).astype(jnp.bfloat16)
    return jnp.dot(h, w2b, preferred_element_type=jnp.float32) + fc2_b


if __name__ == "__main__":
    # SimCLRProjectionHead(input_dim=32, hidden_dim=64), batch of 32 rows.
    B, input_dim, hidden_dim = 32, 32, 64

    key = jax.random.PRNGKey(0)
    kx, k1w, k1b, k2w, k2b = jax.random.split(key, 5)

    x = jax.random.normal(kx, (B, input_dim), dtype=jnp.float32)
    fc1_w = jax.random.normal(k1w, (hidden_dim, input_dim),
                              dtype=jnp.float32) / jnp.sqrt(float(input_dim))
    fc1_b = 0.1 * jax.random.normal(k1b, (hidden_dim,), dtype=jnp.float32)
    fc2_w = jax.random.normal(k2w, (input_dim, hidden_dim),
                              dtype=jnp.float32) / jnp.sqrt(float(hidden_dim))
    fc2_b = 0.1 * jax.random.normal(k2b, (input_dim,), dtype=jnp.float32)

    # One-time weight prep (transpose/pad/bf16) hoisted out of the call path.
    params = jax.block_until_ready(
        jax.tree_util.tree_map(lambda a: a,
                               prepare_simclr_head_params(fc1_w, fc1_b,
                                                          fc2_w, fc2_b)))

    # Default tile_m=256; for B=32 the wrapper picks a 16-row tile so the grid
    # has 2 steps (exercises the pipelined grid and the v7x megacore split).
    out = jax.block_until_ready(
        simclr_projection_head_prepared(x, params))

    ref_matched = jax.block_until_ready(
        simclr_head_ref_matched(x, fc1_w, fc1_b, fc2_w, fc2_b))
    ref_f32 = jax.block_until_ready(
        simclr_head_ref_f32(x, fc1_w, fc1_b, fc2_w, fc2_b))

    assert out.shape == (B, input_dim), out.shape
    # Tight check against the matched-precision (bf16-in, f32-acc) reference.
    assert jnp.allclose(out, ref_matched, rtol=2e-3, atol=2e-3), (
        float(jnp.max(jnp.abs(out - ref_matched))))
    # Sanity check against the full-f32 PyTorch semantics (bf16 input rounding).
    assert jnp.allclose(out, ref_f32, rtol=5e-2, atol=5e-2), (
        float(jnp.max(jnp.abs(out - ref_f32))))

    print("KERNEL_OK")
</pallas_src>

<mosaic_0001>
module attributes {stable_mosaic.version = 11 : i64} {
  func.func @mlp_head_kernel(%arg0: i32, %arg1: memref<16x128xbf16, #tpu.memory_space<vmem>>, %arg2: memref<128x128xbf16, #tpu.memory_space<vmem>>, %arg3: memref<1x128xf32, #tpu.memory_space<vmem>>, %arg4: memref<128x128xbf16, #tpu.memory_space<vmem>>, %arg5: memref<1x128xf32, #tpu.memory_space<vmem>>, %arg6: memref<16x128xf32, #tpu.memory_space<vmem>>) attributes {dimension_semantics = [#tpu.dimension_semantics<parallel>], iteration_bounds = array<i64: 2>, scalar_prefetch = 0 : i64, scratch_operands = 0 : i64, tpu.core_type = #tpu.core_type<tc>, window_params = [{transform_indices = @transform_0, window_bounds = array<i64: 16, 128>}, {pipeline_mode = #tpu.pipeline_mode<synchronous>, transform_indices = @transform_1, window_bounds = array<i64: 128, 128>}, {pipeline_mode = #tpu.pipeline_mode<synchronous>, transform_indices = @transform_2, window_bounds = array<i64: 1, 128>}, {pipeline_mode = #tpu.pipeline_mode<synchronous>, transform_indices = @transform_3, window_bounds = array<i64: 128, 128>}, {pipeline_mode = #tpu.pipeline_mode<synchronous>, transform_indices = @transform_4, window_bounds = array<i64: 1, 128>}, {transform_indices = @transform_5, window_bounds = array<i64: 16, 128>}]} {
    %c0 = arith.constant 0 : index
    %c0_0 = arith.constant 0 : index
    %0 = vector.load %arg1[%c0, %c0_0] : memref<16x128xbf16, #tpu.memory_space<vmem>>, vector<16x128xbf16>
    %c0_1 = arith.constant 0 : index
    %c0_2 = arith.constant 0 : index
    %1 = vector.load %arg2[%c0_1, %c0_2] : memref<128x128xbf16, #tpu.memory_space<vmem>>, vector<128x128xbf16>
    %cst = arith.constant dense<0.000000e+00> : vector<16x128xf32>
    %2 = tpu.matmul %0, %1, %cst {dimension_numbers = #tpu.dot_dimension_numbers<[1], [0], [0], [1], [0, 0, 1, 1], [], []>} : vector<16x128xbf16>, vector<128x128xbf16>, vector<16x128xf32> -> vector<16x128xf32>
    %c0_3 = arith.constant 0 : index
    %c0_4 = arith.constant 0 : index
    %3 = vector.load %arg3[%c0_3, %c0_4] : memref<1x128xf32, #tpu.memory_space<vmem>>, vector<1x128xf32>
    %4 = vector.broadcast %3 : vector<1x128xf32> to vector<16x128xf32>
    %5 = arith.addf %2, %4 : vector<16x128xf32>
    %cst_5 = arith.constant 0.000000e+00 : f32
    %6 = vector.broadcast %cst_5 : f32 to vector<16x128xf32>
    %7 = arith.maximumf %5, %6 : vector<16x128xf32>
    %8 = arith.truncf %7 : vector<16x128xf32> to vector<16x128xbf16>
    %c0_6 = arith.constant 0 : index
    %c0_7 = arith.constant 0 : index
    %9 = vector.load %arg4[%c0_6, %c0_7] : memref<128x128xbf16, #tpu.memory_space<vmem>>, vector<128x128xbf16>
    %cst_8 = arith.constant dense<0.000000e+00> : vector<16x128xf32>
    %10 = tpu.matmul %8, %9, %cst_8 {dimension_numbers = #tpu.dot_dimension_numbers<[1], [0], [0], [1], [0, 0, 1, 1], [], []>} : vector<16x128xbf16>, vector<128x128xbf16>, vector<16x128xf32> -> vector<16x128xf32>
    %c0_9 = arith.constant 0 : index
    %c0_10 = arith.constant 0 : index
    %11 = vector.load %arg5[%c0_9, %c0_10] : memref<1x128xf32, #tpu.memory_space<vmem>>, vector<1x128xf32>
    %12 = vector.broadcast %11 : vector<1x128xf32> to vector<16x128xf32>
    %13 = arith.addf %10, %12 : vector<16x128xf32>
    %c0_11 = arith.constant 0 : index
    %c0_12 = arith.constant 0 : index
    %14 = vector.load %arg6[%c0_11, %c0_12] : memref<16x128xf32, #tpu.memory_space<vmem>>, vector<16x128xf32>
    tpu.vector_store %arg6[%c0_11, %c0_12], %13 {strides = array<i32>} : memref<16x128xf32, #tpu.memory_space<vmem>>, vector<16x128xf32>,
    return
  }
  func.func @transform_0(%arg0: i32) -> (i32, i32) {
    %c0_i32 = arith.constant 0 : i32
    %c0_i32_0 = arith.constant 0 : i32
    return %arg0, %c0_i32 : i32, i32
  }
  func.func @transform_1(%arg0: i32) -> (i32, i32) {
    %c0_i32 = arith.constant 0 : i32
    %c0_i32_0 = arith.constant 0 : i32
    %c0_i32_1 = arith.constant 0 : i32
    return %c0_i32, %c0_i32_0 : i32, i32
  }
  func.func @transform_2(%arg0: i32) -> (i32, i32) {
    %c0_i32 = arith.constant 0 : i32
    %c0_i32_0 = arith.constant 0 : i32
    %c0_i32_1 = arith.constant 0 : i32
    return %c0_i32, %c0_i32_0 : i32, i32
  }
  func.func @transform_3(%arg0: i32) -> (i32, i32) {
    %c0_i32 = arith.constant 0 : i32
    %c0_i32_0 = arith.constant 0 : i32
    %c0_i32_1 = arith.constant 0 : i32
    return %c0_i32, %c0_i32_0 : i32, i32
  }
  func.func @transform_4(%arg0: i32) -> (i32, i32) {
    %c0_i32 = arith.constant 0 : i32
    %c0_i32_0 = arith.constant 0 : i32
    %c0_i32_1 = arith.constant 0 : i32
    return %c0_i32, %c0_i32_0 : i32, i32
  }
  func.func @transform_5(%arg0: i32) -> (i32, i32) {
    %c0_i32 = arith.constant 0 : i32
    %c0_i32_0 = arith.constant 0 : i32
    return %arg0, %c0_i32 : i32, i32
  }
}

module attributes {stable_mosaic.version = 11 : i64} {
  func.func @mlp_head_kernel(%arg0: i32, %arg1: memref<16x128xbf16, #tpu.memory_space<vmem>>, %arg2: memref<128x128xbf16, #tpu.memory_space<vmem>>, %arg3: memref<1x128xf32, #tpu.memory_space<vmem>>, %arg4: memref<128x128xbf16, #tpu.memory_space<vmem>>, %arg5: memref<1x128xf32, #tpu.memory_space<vmem>>, %arg6: memref<16x128xf32, #tpu.memory_space<vmem>>) attributes {dimension_semantics = [#tpu.dimension_semantics<parallel>], iteration_bounds = array<i64: 2>, scalar_prefetch = 0 : i64, scratch_operands = 0 : i64, tpu.core_type = #tpu.core_type<tc>, window_params = [{transform_indices = @transform_0, window_bounds = array<i64: 16, 128>}, {pipeline_mode = #tpu.pipeline_mode<synchronous>, transform_indices = @transform_1, window_bounds = array<i64: 128, 128>}, {pipeline_mode = #tpu.pipeline_mode<synchronous>, transform_indices = @transform_2, window_bounds = array<i64: 1, 128>}, {pipeline_mode = #tpu.pipeline_mode<synchronous>, transform_indices = @transform_3, window_bounds = array<i64: 128, 128>}, {pipeline_mode = #tpu.pipeline_mode<synchronous>, transform_indices = @transform_4, window_bounds = array<i64: 1, 128>}, {transform_indices = @transform_5, window_bounds = array<i64: 16, 128>}]} {
    %c0 = arith.constant 0 : index
    %c0_0 = arith.constant 0 : index
    %0 = vector.load %arg1[%c0, %c0_0] : memref<16x128xbf16, #tpu.memory_space<vmem>>, vector<16x128xbf16>
    %c0_1 = arith.constant 0 : index
    %c0_2 = arith.constant 0 : index
    %1 = vector.load %arg2[%c0_1, %c0_2] : memref<128x128xbf16, #tpu.memory_space<vmem>>, vector<128x128xbf16>
    %cst = arith.constant dense<0.000000e+00> : vector<16x128xf32>
    %2 = tpu.matmul %0, %1, %cst {dimension_numbers = #tpu.dot_dimension_numbers<[1], [0], [0], [1], [0, 0, 1, 1], [], []>} : vector<16x128xbf16>, vector<128x128xbf16>, vector<16x128xf32> -> vector<16x128xf32>
    %c0_3 = arith.constant 0 : index
    %c0_4 = arith.constant 0 : index
    %3 = vector.load %arg3[%c0_3, %c0_4] : memref<1x128xf32, #tpu.memory_space<vmem>>, vector<1x128xf32>
    %4 = vector.broadcast %3 : vector<1x128xf32> to vector<16x128xf32>
    %5 = arith.addf %2, %4 : vector<16x128xf32>
    %cst_5 = arith.constant 0.000000e+00 : f32
    %6 = vector.broadcast %cst_5 : f32 to vector<16x128xf32>
    %7 = arith.maximumf %5, %6 : vector<16x128xf32>
    %8 = arith.truncf %7 : vector<16x128xf32> to vector<16x128xbf16>
    %c0_6 = arith.constant 0 : index
    %c0_7 = arith.constant 0 : index
    %9 = vector.load %arg4[%c0_6, %c0_7] : memref<128x128xbf16, #tpu.memory_space<vmem>>, vector<128x128xbf16>
    %cst_8 = arith.constant dense<0.000000e+00> : vector<16x128xf32>
    %10 = tpu.matmul %8, %9, %cst_8 {dimension_numbers = #tpu.dot_dimension_numbers<[1], [0], [0], [1], [0, 0, 1, 1], [], []>} : vector<16x128xbf16>, vector<128x128xbf16>, vector<16x128xf32> -> vector<16x128xf32>
    %c0_9 = arith.constant 0 : index
    %c0_10 = arith.constant 0 : index
    %11 = vector.load %arg5[%c0_9, %c0_10] : memref<1x128xf32, #tpu.memory_space<vmem>>, vector<1x128xf32>
    %12 = vector.broadcast %11 : vector<1x128xf32> to vector<16x128xf32>
    %13 = arith.addf %10, %12 : vector<16x128xf32>
    %c0_11 = arith.constant 0 : index
    %c0_12 = arith.constant 0 : index
    %14 = vector.load %arg6[%c0_11, %c0_12] : memref<16x128xf32, #tpu.memory_space<vmem>>, vector<16x128xf32>
    tpu.vector_store %arg6[%c0_11, %c0_12], %13 {strides = array<i32>} : memref<16x128xf32, #tpu.memory_space<vmem>>, vector<16x128xf32>,
    return
  }
  func.func @transform_0(%arg0: i32) -> (i32, i32) {
    %c0_i32 = arith.constant 0 : i32
    %c0_i32_0 = arith.constant 0 : i32
    return %arg0, %c0_i32 : i32, i32
  }
  func.func @transform_1(%arg0: i32) -> (i32, i32) {
    %c0_i32 = arith.constant 0 : i32
    %c0_i32_0 = arith.constant 0 : i32
    %c0_i32_1 = arith.constant 0 : i32
    return %c0_i32, %c0_i32_0 : i32, i32
  }
  func.func @transform_2(%arg0: i32) -> (i32, i32) {
    %c0_i32 = arith.constant 0 : i32
    %c0_i32_0 = arith.constant 0 : i32
    %c0_i32_1 = arith.constant 0 : i32
    return %c0_i32, %c0_i32_0 : i32, i32
  }
  func.func @transform_3(%arg0: i32) -> (i32, i32) {
    %c0_i32 = arith.constant 0 : i32
    %c0_i32_0 = arith.constant 0 : i32
    %c0_i32_1 = arith.constant 0 : i32
    return %c0_i32, %c0_i32_0 : i32, i32
  }
  func.func @transform_4(%arg0: i32) -> (i32, i32) {
    %c0_i32 = arith.constant 0 : i32
    %c0_i32_0 = arith.constant 0 : i32
    %c0_i32_1 = arith.constant 0 : i32
    return %c0_i32, %c0_i32_0 : i32, i32
  }
  func.func @transform_5(%arg0: i32) -> (i32, i32) {
    %c0_i32 = arith.constant 0 : i32
    %c0_i32_0 = arith.constant 0 : i32
    return %arg0, %c0_i32 : i32, i32
  }
}

</mosaic_0001>

<bundles_post_ra>
// kernel: tpu_custom_call.1
= control target key start
LH: loop header
LB: loop body
LE: loop exit
PB: predicated region body
PF: predicated region fallthrough
CT: control target
= control target key end

     0   :  { %10 = vsyncpa [#allocation3], 0  ;;  %s1256_s0 = inlined_call_operand.hbm [shape: bf16[32,128], index: 0, kind: input, shape index: {}]   ;;  %s1257_s1 = inlined_call_operand.hbm [shape: bf16[128,128], index: 1, kind: input, shape index: {}]   ;;  %s1258_s2 = inlined_call_operand.vmem [shape: f32[1,128], index: 2, kind: input, shape index: {}]   ;;  %s1259_s3 = inlined_call_operand.hbm [shape: bf16[128,128], index: 3, kind: input, shape index: {}]   ;;  %s1260_s4 = inlined_call_operand.vmem [shape: f32[1,128], index: 4, kind: input, shape index: {}]   ;;  %s1261_s5 = inlined_call_operand.hbm [shape: f32[32,128], index: 5, kind: output, shape index: {}]  }
   0x1   :  { %12 = vsyncpa [#allocation3 + $0x1], 0 }
   0x2   :  { %13 = vsyncpa [#allocation6], 0 }
   0x3   :  { %14 = vsyncpa [#allocation4], 0 }
   0x4   :  { %16 = vsyncpa [#allocation4 + $0x1], 0  ;;  %s1003_s18 = smov 0   ;;  %s1005_s19 = smov 0  }
   0x5   :  { %s1007_s20 = smov 0   ;;  %s1009_s21 = smov 0  }
   0x6 LB: > { %s1024_s22 = sadd.s32 4294967295, %s961_s21   ;;  %s618_s23 = sadd.s32 4294967294, %s961_s21   ;;  %s961_s21 = sphi %s1009_s21, %s1281_s21   ;;  %s957_s20 = sphi %s1007_s20, %s1280_s20   ;;  %s953_s19 = sphi %s1005_s19, %s1279_s19   ;;  %s949_s18 = sphi %s1003_s18, %s1278_s18  }
   0x7   : > { %p42_p0 = scmp.ne.s32.totalorder %s953_s19, %s949_s18  ;;  %p1262_p1 = scmp.eq.s32.totalorder %s1024_s22, 0 }
   0x8   : > { %p156_p3 = scmp.eq.s32.totalorder %s618_s23, 1  ;;  %p619_p5 = scmp.ge.s32.totalorder %s961_s21, 1 }
   0x9   : > { %p1033_p4 = por %p1262_p1, %p42_p0  ;;  %p163_p7 = scmp.lt.s32.totalorder %s961_s21, 3 }
   0xa   : > { %p1038_p6 = por %p156_p3, %p42_p0  ;;  %s963_s27 = smov [#allocation5]  }
   0xb   : > { %s1265_s24 = scalar_select %p1033_p4, 1, 0 }
   0xc   : > { %s1266_s25 = scalar_select %p1038_p6, 1, 0 }
   0xd   : > { %p1043_p8 = pnand %p619_p5, %p163_p7  ;;  %s175_s28 = sshll.u32 %s963_s27, 4  ;;  %s1047_s28 = int_to_ptr.vmem [resolvable:$true] %s175_s28 }
   0xe   : > { %s964_s30 = smov [#allocation7]   ;;  %s805_s9 = scalar_lea.hbm %s1257_s1, 1024 }
   0xf   : > { %p727_p9 = pneg %p1043_p8  ;;  %s191_s6 = sshll.u32 %s964_s30, 4  ;;  %s1058_s6 = int_to_ptr.vmem [resolvable:$true] %s191_s6 }
  0x10   : > { %p806_p12 = scmp.ne.s32.totalorder %s1257_s1, %s805_s9  ;;  %p812_p5 = scmp.lt.u32.totalorder %s805_s9, %s1257_s1 }
  0x11   : > { %p1054_p11 = pnand %p727_p9, %p1262_p1 }
  0x13   : > { %p807_p13 = pneg %p1054_p11 }
  0x15   : > { %p808_p0 = pnand %p807_p13, %p806_p12 }
  0x17   : > { %p809_p3 = pneg %p808_p0 }
  0x19   : > { %p814_p7 = pnand %p812_p5, %p809_p3 }
  0x1b   : > { %817 = shalt.err (!%p814_p7)
}
  0x1c   : > { %s818_s14 = scalar_lea.vmem %s1047_s28, 1024  ;;  %p826_p2 = scmp.lt.s32.totalorder %s1047_s28, %s1047_s28 }
  0x1d   : > { %p819_p9 = scmp.ne.s32.totalorder %s1047_s28, %s818_s14  ;;  %p827_p12 = scmp.lt.s32.totalorder %s818_s14, %s818_s14 }
  0x1f   : > { %p821_p10 = pnand %p819_p9, %p807_p13  ;;  %p828_p0 = por %p827_p12, %p826_p2 }
  0x21   : > { %p822_p1 = pneg %p821_p10 }
  0x23   : > { %p829_p6 = pnand %p828_p0, %p822_p1 }
  0x25   : > { %832 = shalt.err (!%p829_p6)
}
  0x26   : > { %s965_s15 = smov 64   ;;  %s966_s16 = smov 4  }
  0x27   : > { %730 = dma.hbm_to_vmem [thread:$0]  (!%p1054_p11), %s1257_s1, 1024, %s1047_s28, [#allocation6], %s965_s15, %s965_s15, %s966_s16  }
  0x28   : > { %s833_s7 = scalar_lea.hbm %s1259_s3, 1024 }
  0x29   : > { %p834_p1 = scmp.ne.s32.totalorder %s1259_s3, %s833_s7  ;;  %p840_p10 = scmp.lt.u32.totalorder %s833_s7, %s1259_s3 }
  0x2b   : > { %p836_p2 = pnand %p834_p1, %p807_p13 }
  0x2d   : > { %p837_p6 = pneg %p836_p2 }
  0x2f   : > { %p842_p3 = pnand %p840_p10, %p837_p6 }
  0x31   : > { %845 = shalt.err (!%p842_p3)
}
  0x32   : > { %s846_s28 = scalar_lea.vmem %s1058_s6, 1024  ;;  %p854_p12 = scmp.lt.s32.totalorder %s1058_s6, %s1058_s6 }
  0x33   : > { %p847_p5 = scmp.ne.s32.totalorder %s1058_s6, %s846_s28  ;;  %p855_p0 = scmp.lt.s32.totalorder %s846_s28, %s846_s28 }
  0x35   : > { %p849_p7 = pnand %p847_p5, %p807_p13  ;;  %p856_p1 = por %p855_p0, %p854_p12 }
  0x37   : > { %p850_p9 = pneg %p849_p7 }
  0x39   : > { %p857_p2 = pnand %p856_p1, %p850_p9 }
  0x3b   : > { %860 = shalt.err (!%p857_p2)
}
  0x3c   : > { %733 = dma.hbm_to_vmem [thread:$0]  (!%p1054_p11), %s1259_s3, 1024, %s1058_s6, [#allocation6], %s965_s15, %s965_s15, %s966_s16  }
  0x3d   : > { %s1119_s29 = sadd.s32 1, %s961_s21   ;;  %s29_s14 = sadd.s32 1, %s957_s20 }
  0x3e   : > { %s26_s17 = ssub.s32 %s961_s21, %s1119_s29  ;;  %p36_p13 = scmp.ne.s32.totalorder %s957_s20, %s953_s19 }
  0x3f   : > { %p27_p6 = scmp.eq.s32.totalorder %s26_s17, 0  ;;  %p37_p10 = scmp.eq.s32.totalorder %s961_s21, 0 }
  0x40   : > { %p1269_p3 = scmp.eq.s32.totalorder %s1024_s22, 1  ;;  %p744_p7 = scmp.lt.s32.totalorder %s961_s21, 2 }
  0x41   : > { %s1135_s27 = scalar_select %p27_p6, %s957_s20, %s29_s14  }
  0x42   : > { %p1129_p5 = por %p1269_p3, %p36_p13  ;;  %p38_p9 = por %p37_p10, %p36_p13 }
  0x43   : > { %s208_s30 = sand.u32 1, %s957_s20   ;;  %s655_s6 = sshll.u32 %s961_s21, 7 }
  0x44   : > { %s1270_s23 = scalar_select %p1129_p5, 1, 0 }
  0x45   : > { %s623_s7 = sshll.u32 %s208_s30, 3  ;;  %s1142_s10 = scalar_lea.hbm %s1256_s0, %s655_s6 }
  0x46   : > { %s212_s11 = scalar_lea.vmem [#allocation2], %s623_s7  ;;  %p1146_p11 = pnand %p744_p7, %p38_p9 }
  0x47   : > { %s219_s28 = sshll.u32 %s212_s11, 4  ;;  %s1150_s13 = scalar_lea.sflag [#allocation3], %s208_s30  ;;  %s1144_s28 = int_to_ptr.vmem [resolvable:$true] %s219_s28 }
  0x48   : > { %s861_s14 = scalar_lea.hbm %s1142_s10, 128  ;;  %p863_p0 = pneg %p1146_p11 }
  0x49   : > { %p862_p12 = scmp.ne.s32.totalorder %s1142_s10, %s861_s14  ;;  %s866_s6 = scalar_lea.hbm %s1256_s0, 256 }
  0x4a   : > { %p867_p13 = scmp.lt.u32.totalorder %s1142_s10, %s1256_s0  ;;  %p868_p6 = scmp.lt.u32.totalorder %s866_s6, %s861_s14 }
  0x4b   : > { %p864_p1 = pnand %p863_p0, %p862_p12  ;;  %p870_p3 = scmp.lt.u32.totalorder %s861_s14, %s1142_s10 }
  0x4c   : > { %p869_p10 = por %p868_p6, %p867_p13 }
  0x4d   : > { %p865_p2 = pneg %p864_p1 }
  0x4e   : > { %p871_p7 = por %p870_p3, %p869_p10 }
  0x50   : > { %p872_p9 = pnand %p871_p7, %p865_p2 }
  0x52   : > { %875 = shalt.err (!%p872_p9)
}
  0x53   : > { %s876_s30 = scalar_lea.vmem %s1144_s28, 128  ;;  %s967_s11 = smov [#allocation2]  }
  0x54   : > { %p877_p12 = scmp.ne.s32.totalorder %s1144_s28, %s876_s30  ;;  %s881_s17 = sshll.u32 %s967_s11, 4  ;;  %s882_s17 = int_to_ptr.vmem [resolvable:$false] %s881_s17 }
  0x55   : > { %s883_s7 = scalar_lea.vmem %s882_s17, 256  ;;  %p884_p4 = scmp.lt.s32.totalorder %s1144_s28, %s882_s17 }
  0x56   : > { %p879_p1 = pnand %p877_p12, %p863_p0  ;;  %p885_p13 = scmp.lt.s32.totalorder %s883_s7, %s876_s30 }
  0x58   : > { %p880_p5 = pneg %p879_p1  ;;  %p886_p6 = por %p885_p13, %p884_p4 }
  0x5a   : > { %p887_p10 = pnand %p886_p6, %p880_p5 }
  0x5c   : > { %890 = shalt.err (!%p887_p10)
}
  0x5d   : > { %737 = dma.hbm_to_vmem [thread:$0]  (!%p1146_p11), %s1142_s10, 128, %s1144_s28, %s1150_s13, %s965_s15, %s965_s15, %s966_s16  }
  0x5e   : > { %231 = sbr.rel (%p1043_p8) target bundleno = 590 (0x24e), region = 40  ;;  %s1184_s14 = sand.u32 (!%p1043_p8), 1, %s953_s19  }
  0x5f   : > { %s627_s6 = sshll.u32 (!%p1043_p8), %s1184_s14, 3  ;;  %s234_s8 = scalar_lea.sflag (!%p1043_p8), [#allocation3], %s1184_s14 }
  0x60   : > { %s1188_s9 = scalar_lea.vmem (!%p1043_p8), [#allocation2], %s627_s6  ;;  %p1272_p4 = scmp.ne.s32.totalorder (!%p1043_p8), %s1265_s24, 0 }
  0x65   : > { %936 = dma.done.wait (%p1272_p4), %s234_s8, 128  }
  0x66   : > { %938 = vsyncadd (%p1272_p4), %s234_s8, 4294967168  ;;  %p1273_p5 = scmp.eq.s32.totalorder %s1024_s22, 0 }
  0x68   : > { %940 = dma.done.wait (%p1273_p5), [#allocation6], 2048   ;;  %p1274_p8 = pmov %p1273_p5 }
  0x69   : > { %v968_v0 = vmov 0.0   ;;  %vm969_vm0 = vmmov 0   ;;  %v788_v1 = vld [vmem:[#allocation5] sm:$0xff]   ;;  %v789_v2 = vld [vmem:[#allocation5 + $0x8] sm:$0xff]   ;;  %v790_v3 = vld [vmem:[#allocation5 + $0x10] sm:$0xff]   ;;  %s630_s15 = sshll.u32 %s1184_s14, 4 }
  0x6a   : > { %942 = vsyncadd (%p1274_p8), [#allocation6], 4294965248  ;;  %675 = vmatprep.subr.bf16.mxu0 %v968_v0  ;;  %691 = vmatprep.mubr.msk.bf16.mxu0 %vm969_vm0, %v968_v0  ;;  %v797_v4 = vld [vmem:[#allocation7] sm:$0xff]   ;;  %v791_v5 = vld [vmem:[#allocation5 + $0x18] sm:$0xff]   ;;  %s271_s28 = scalar_lea.vmem [#allocation8], %s630_s15  ;;  %s656_s13 = sshll.u32 %s1024_s22, 8 }
  0x6b   : > { %695 = vmatprep.subr.bf16.mxu1 %v968_v0  ;;  %711 = vmatprep.mubr.msk.bf16.mxu1 %vm969_vm0, %v968_v0  ;;  %v798_v6 = vld [vmem:[#allocation7 + $0x8] sm:$0xff]   ;;  %v792_v7 = vld [vmem:[#allocation5 + $0x20] sm:$0xff]   ;;  %v799_v8 = vld [vmem:[#allocation7 + $0x10] sm:$0xff]   ;;  %s526_s12 = sshll.u32 %s271_s28, 4  ;;  %s1212_s17 = scalar_lea.hbm %s1261_s5, %s656_s13  ;;  %s1207_s12 = int_to_ptr.vmem [resolvable:$true] %s526_s12 }
  0x6c   : > { %676 = vmatpush3.bf16.msra.mxu0 %v788_v1  ;;  %696 = vmatpush3.bf16.msra.mxu1 %v797_v4  ;;  %v793_v9 = vld [vmem:[#allocation5 + $0x28] sm:$0xff]   ;;  %v800_v10 = vld [vmem:[#allocation7 + $0x18] sm:$0xff]   ;;  %v794_v11 = vld [vmem:[#allocation5 + $0x30] sm:$0xff]   ;;  %s513_s7 = scalar_lea.sflag [#allocation4], %s1184_s14  ;;  %s891_s22 = scalar_lea.vmem %s1207_s12, 256 }
  0x6d   : > { %677 = vmatprep.subr.bf16.mxu0 %v968_v0  ;;  %697 = vmatprep.subr.bf16.mxu1 %v968_v0  ;;  %v801_v12 = vld [vmem:[#allocation7 + $0x20] sm:$0xff]   ;;  %v795_v13 = vld [vmem:[#allocation5 + $0x38] sm:$0xff]   ;;  %v802_v14 = vld [vmem:[#allocation7 + $0x28] sm:$0xff]   ;;  %p892_p11 = scmp.ne.s32.totalorder %s1207_s12, %s891_s22  ;;  %p1275_p0 = scmp.ne.s32.totalorder %s1270_s23, 0 }
  0x6e   : > { %v796_v15 = vld [vmem:[%s1188_s9] sm:$0xff]   ;;  %s970_s6 = smov [#allocation8]  }
  0x6f   : > { %v803_v16 = vld [vmem:[#allocation7 + $0x30] sm:$0xff]   ;;  %v804_v17 = vld [vmem:[#allocation7 + $0x38] sm:$0xff]   ;;  %p893_p2 = pnand %p892_p11, %p1275_p0  ;;  %s895_s8 = sshll.u32 %s970_s6, 4  ;;  %s896_s8 = int_to_ptr.vmem [resolvable:$false] %s895_s8 }
  0x70   : > { %678 = vmatpush3.bf16.msra.mxu0 %v789_v2  ;;  %698 = vmatpush3.bf16.msra.mxu1 %v798_v6  ;;  %v631_v18 = vld [vmem:[%s1258_s2] ss:$0 sm:$0xff]  ;;  %s897_s9 = scalar_lea.vmem %s896_s8, 512  ;;  %p898_p7 = scmp.lt.s32.totalorder %s1207_s12, %s896_s8 }
  0x71   : > { %679 = vmatprep.subr.bf16.mxu0 %v968_v0  ;;  %699 = vmatprep.subr.bf16.mxu1 %v968_v0  ;;  %v641_v28 = vld [vmem:[%s1260_s4] ss:$0 sm:$0xff]  ;;  %p894_p3 = pneg %p893_p2  ;;  %p899_p9 = scmp.lt.s32.totalorder %s897_s9, %s891_s22 }
  0x73   : > { %p900_p12 = por %p899_p9, %p898_p7 }
  0x74   : > { %680 = vmatpush3.bf16.msra.mxu0 %v790_v3  ;;  %700 = vmatpush3.bf16.msra.mxu1 %v799_v8 }
  0x75   : > { %681 = vmatprep.subr.bf16.mxu0 %v968_v0  ;;  %701 = vmatprep.subr.bf16.mxu1 %v968_v0  ;;  %p901_p1 = pnand %p900_p12, %p894_p3 }
  0x78   : > { %682 = vmatpush3.bf16.msra.mxu0 %v791_v5  ;;  %702 = vmatpush3.bf16.msra.mxu1 %v800_v10 }
  0x79   : > { %683 = vmatprep.subr.bf16.mxu0 %v968_v0  ;;  %703 = vmatprep.subr.bf16.mxu1 %v968_v0 }
  0x7c   : > { %684 = vmatpush3.bf16.msra.mxu0 %v792_v7  ;;  %704 = vmatpush3.bf16.msra.mxu1 %v801_v12 }
  0x7d   : > { %685 = vmatprep.subr.bf16.mxu0 %v968_v0  ;;  %705 = vmatprep.subr.bf16.mxu1 %v968_v0 }
  0x80   : > { %686 = vmatpush3.bf16.msra.mxu0 %v793_v9  ;;  %706 = vmatpush3.bf16.msra.mxu1 %v802_v14 }
  0x81   : > { %687 = vmatprep.subr.bf16.mxu0 %v968_v0  ;;  %707 = vmatprep.subr.bf16.mxu1 %v968_v0 }
  0x84   : > { %688 = vmatpush3.bf16.msra.mxu0 %v794_v11  ;;  %708 = vmatpush3.bf16.msra.mxu1 %v803_v16 }
  0x85   : > { %689 = vmatprep.subr.bf16.mxu0 %v968_v0  ;;  %709 = vmatprep.subr.bf16.mxu1 %v968_v0 }
  0x88   : > { %690 = vmatpush3.bf16.msra.mxu0 %v795_v13  ;;  %710 = vmatpush3.bf16.msra.mxu1 %v804_v17 }
  0x8b   : > { %692 = vmatmul.mubr.bf16.vlgmr.msra.gmra.mrb[0].mxu0 %v796_v15 }
 0x15e   : > { %v388_v19 = vpop.f32.mrb[0].mxu0 }
 0x15f   : > { %v389_v20 = vadd.f32 %v631_v18, %v388_v19  ;;  %v693_v21 = vpop.f32.mrb[1].mxu0 }
 0x160   : > { %v391_v22 = vpop.f32.mrb[2].mxu0 }
 0x161   : > { %v392_v23 = vadd.f32 %v631_v18, %v391_v22  ;;  %v694_v24 = vpop.f32.mrb[3].mxu0  ;;  %v395_v25 = vmax.f32 %v389_v20, 0.0 }
 0x163   : > { %v396_v26 = vmax.f32 %v392_v23, 0.0 }
 0x165   : > { %v397_v27 = vpack.c.bf16 %v396_v26, %v395_v25 }
 0x167   : > { %712 = vmatmul.mubr.bf16.vlgmr.msra.gmra.mrb[0].mxu1 %v397_v27 }
 0x23a   : > { %v503_v29 = vpop.f32.mrb[0].mxu1 }
 0x23b   : > { %v504_v30 = vadd.f32 %v641_v28, %v503_v29  ;;  %v713_v31 = vpop.f32.mrb[1].mxu1 }
 0x23c   : > { %v506_v32 = vpop.f32.mrb[2].mxu1 }
 0x23d   : > { %510 = vst [vmem:[%s271_s28] sm:$0xff] %v504_v30  ;;  %v507_v33 = vadd.f32 %v641_v28, %v506_v32  ;;  %v714_v34 = vpop.f32.mrb[3].mxu1 }
 0x23f   : > { %511 = vst [vmem:[%s271_s28 + $0x8] sm:$0xff] %v507_v33 }
 0x240   : > { %904 = shalt.err (!%p901_p1)
}
 0x241   : > { %s905_s24 = scalar_lea.hbm %s1212_s17, 256  ;;  %s909_s16 = scalar_lea.hbm %s1261_s5, 512 }
 0x242   : > { %p906_p13 = scmp.ne.s32.totalorder %s1212_s17, %s905_s24  ;;  %p910_p4 = scmp.lt.u32.totalorder %s1212_s17, %s1261_s5 }
 0x243   : > { %p911_p5 = scmp.lt.u32.totalorder %s909_s16, %s905_s24  ;;  %p913_p11 = scmp.lt.u32.totalorder %s905_s24, %s1212_s17 }
 0x244   : > { %p907_p6 = pnand %p906_p13, %p1275_p0 }
 0x245   : > { %p912_p8 = por %p911_p5, %p910_p4 }
 0x246   : > { %p908_p10 = pneg %p907_p6 }
 0x247   : > { %p914_p2 = por %p913_p11, %p912_p8 }
 0x249   : > { %p915_p3 = pnand %p914_p2, %p908_p10 }
 0x24b   : > { %918 = shalt.err (!%p915_p3)
}
 0x24c   : > { %s971_s13 = smov 128   ;;  %s972_s30 = smov 8  }
 0x24d   : > { %725 = dma.vmem_to_hbm [thread:$0]  (%p1275_p0), %s1207_s12, 256, %s1212_s17, %s513_s7, %s971_s13, %s971_s13, %s972_s30  }
 0x24e PF: > { %s541_s11 = sand.u32 1, %s949_s18   ;;  %p1276_p7 = scmp.ne.s32.totalorder %s1266_s25, 0 }
 0x24f   : > { %p1277_p9 = scmp.ge.s32.totalorder %s961_s21, 2  ;;  %s542_s22 = scalar_lea.sflag [#allocation4], %s541_s11 }
 0x251   : > { %p739_p12 = pnand %p1277_p9, %p1276_p7 }
 0x253   : > { %944 = dma.done.wait (!%p739_p12), %s542_s22, 256  }
 0x254   : > { %946 = vsyncadd (!%p739_p12), %s542_s22, 4294967040  ;;  %p19_p1 = scmp.ge.s32.totalorder %s1119_s29, 4   ;;  %s1278_s18 = smov %s953_s19 }
 0x255   : > { %s1279_s19 = smov %s957_s20  ;;  %s1280_s20 = smov %s1135_s27 }
 0x256   : > { %s1281_s21 = smov %s1119_s29  ;;  %21 = sbr.rel (!%p19_p1) target bundleno = 6 (0x6), region = 93 }
 0x25d   :  { %547 = vsyncpa [#allocation3], 1 }
 0x25e   :  { %549 = vsyncpa [#allocation3 + $0x1], 1 }
 0x25f   :  { %550 = vsyncpa [#allocation6], 1 }
 0x260   :  { %551 = vsyncpa [#allocation4], 1 }
 0x261   :  { %553 = vsyncpa [#allocation4 + $0x1], 1 }

// kernel: tpu_custom_call.1
= control target key start
LH: loop header
LB: loop body
LE: loop exit
PB: predicated region body
PF: predicated region fallthrough
CT: control target
= control target key end

     0   :  { %10 = vsyncpa [#allocation3], 0  ;;  %s1256_s0 = inlined_call_operand.hbm [shape: bf16[32,128], index: 0, kind: input, shape index: {}]   ;;  %s1257_s1 = inlined_call_operand.hbm [shape: bf16[128,128], index: 1, kind: input, shape index: {}]   ;;  %s1258_s2 = inlined_call_operand.vmem [shape: f32[1,128], index: 2, kind: input, shape index: {}]   ;;  %s1259_s3 = inlined_call_operand.hbm [shape: bf16[128,128], index: 3, kind: input, shape index: {}]   ;;  %s1260_s4 = inlined_call_operand.vmem [shape: f32[1,128], index: 4, kind: input, shape index: {}]   ;;  %s1261_s5 = inlined_call_operand.hbm [shape: f32[32,128], index: 5, kind: output, shape index: {}]  }
   0x1   :  { %12 = vsyncpa [#allocation3 + $0x1], 0 }
   0x2   :  { %13 = vsyncpa [#allocation6], 0 }
   0x3   :  { %14 = vsyncpa [#allocation4], 0 }
   0x4   :  { %16 = vsyncpa [#allocation4 + $0x1], 0  ;;  %s1003_s18 = smov 0   ;;  %s1005_s19 = smov 0  }
   0x5   :  { %s1007_s20 = smov 0   ;;  %s1009_s21 = smov 0  }
   0x6 LB: > { %s1024_s22 = sadd.s32 4294967295, %s961_s21   ;;  %s618_s23 = sadd.s32 4294967294, %s961_s21   ;;  %s961_s21 = sphi %s1009_s21, %s1281_s21   ;;  %s957_s20 = sphi %s1007_s20, %s1280_s20   ;;  %s953_s19 = sphi %s1005_s19, %s1279_s19   ;;  %s949_s18 = sphi %s1003_s18, %s1278_s18  }
   0x7   : > { %p42_p0 = scmp.ne.s32.totalorder %s953_s19, %s949_s18  ;;  %p1262_p1 = scmp.eq.s32.totalorder %s1024_s22, 0 }
   0x8   : > { %p156_p3 = scmp.eq.s32.totalorder %s618_s23, 1  ;;  %p619_p5 = scmp.ge.s32.totalorder %s961_s21, 1 }
   0x9   : > { %p1033_p4 = por %p1262_p1, %p42_p0  ;;  %p163_p7 = scmp.lt.s32.totalorder %s961_s21, 3 }
   0xa   : > { %p1038_p6 = por %p156_p3, %p42_p0  ;;  %s963_s27 = smov [#allocation5]  }
   0xb   : > { %s1265_s24 = scalar_select %p1033_p4, 1, 0 }
   0xc   : > { %s1266_s25 = scalar_select %p1038_p6, 1, 0 }
   0xd   : > { %p1043_p8 = pnand %p619_p5, %p163_p7  ;;  %s175_s28 = sshll.u32 %s963_s27, 4  ;;  %s1047_s28 = int_to_ptr.vmem [resolvable:$true] %s175_s28 }
   0xe   : > { %s964_s30 = smov [#allocation7]   ;;  %s805_s9 = scalar_lea.hbm %s1257_s1, 1024 }
   0xf   : > { %p727_p9 = pneg %p1043_p8  ;;  %s191_s6 = sshll.u32 %s964_s30, 4  ;;  %s1058_s6 = int_to_ptr.vmem [resolvable:$true] %s191_s6 }
  0x10   : > { %p806_p12 = scmp.ne.s32.totalorder %s1257_s1, %s805_s9  ;;  %p812_p5 = scmp.lt.u32.totalorder %s805_s9, %s1257_s1 }
  0x11   : > { %p1054_p11 = pnand %p727_p9, %p1262_p1 }
  0x13   : > { %p807_p13 = pneg %p1054_p11 }
  0x15   : > { %p808_p0 = pnand %p807_p13, %p806_p12 }
  0x17   : > { %p809_p3 = pneg %p808_p0 }
  0x19   : > { %p814_p7 = pnand %p812_p5, %p809_p3 }
  0x1b   : > { %817 = shalt.err (!%p814_p7)
}
  0x1c   : > { %s818_s14 = scalar_lea.vmem %s1047_s28, 1024  ;;  %p826_p2 = scmp.lt.s32.totalorder %s1047_s28, %s1047_s28 }
  0x1d   : > { %p819_p9 = scmp.ne.s32.totalorder %s1047_s28, %s818_s14  ;;  %p827_p12 = scmp.lt.s32.totalorder %s818_s14, %s818_s14 }
  0x1f   : > { %p821_p10 = pnand %p819_p9, %p807_p13  ;;  %p828_p0 = por %p827_p12, %p826_p2 }
  0x21   : > { %p822_p1 = pneg %p821_p10 }
  0x23   : > { %p829_p6 = pnand %p828_p0, %p822_p1 }
  0x25   : > { %832 = shalt.err (!%p829_p6)
}
  0x26   : > { %s965_s15 = smov 64   ;;  %s966_s16 = smov 4  }
  0x27   : > { %730 = dma.hbm_to_vmem [thread:$0]  (!%p1054_p11), %s1257_s1, 1024, %s1047_s28, [#allocation6], %s965_s15, %s965_s15, %s966_s16  }
  0x28   : > { %s833_s7 = scalar_lea.hbm %s1259_s3, 1024 }
  0x29   : > { %p834_p1 = scmp.ne.s32.totalorder %s1259_s3, %s833_s7  ;;  %p840_p10 = scmp.lt.u32.totalorder %s833_s7, %s1259_s3 }
  0x2b   : > { %p836_p2 = pnand %p834_p1, %p807_p13 }
  0x2d   : > { %p837_p6 = pneg %p836_p2 }
  0x2f   : > { %p842_p3 = pnand %p840_p10, %p837_p6 }
  0x31   : > { %845 = shalt.err (!%p842_p3)
}
  0x32   : > { %s846_s28 = scalar_lea.vmem %s1058_s6, 1024  ;;  %p854_p12 = scmp.lt.s32.totalorder %s1058_s6, %s1058_s6 }
  0x33   : > { %p847_p5 = scmp.ne.s32.totalorder %s1058_s6, %s846_s28  ;;  %p855_p0 = scmp.lt.s32.totalorder %s846_s28, %s846_s28 }
  0x35   : > { %p849_p7 = pnand %p847_p5, %p807_p13  ;;  %p856_p1 = por %p855_p0, %p854_p12 }
  0x37   : > { %p850_p9 = pneg %p849_p7 }
  0x39   : > { %p857_p2 = pnand %p856_p1, %p850_p9 }
  0x3b   : > { %860 = shalt.err (!%p857_p2)
}
  0x3c   : > { %733 = dma.hbm_to_vmem [thread:$0]  (!%p1054_p11), %s1259_s3, 1024, %s1058_s6, [#allocation6], %s965_s15, %s965_s15, %s966_s16  }
  0x3d   : > { %s1119_s29 = sadd.s32 1, %s961_s21   ;;  %s29_s14 = sadd.s32 1, %s957_s20 }
  0x3e   : > { %s26_s17 = ssub.s32 %s961_s21, %s1119_s29  ;;  %p36_p13 = scmp.ne.s32.totalorder %s957_s20, %s953_s19 }
  0x3f   : > { %p27_p6 = scmp.eq.s32.totalorder %s26_s17, 0  ;;  %p37_p10 = scmp.eq.s32.totalorder %s961_s21, 0 }
  0x40   : > { %p1269_p3 = scmp.eq.s32.totalorder %s1024_s22, 1  ;;  %p744_p7 = scmp.lt.s32.totalorder %s961_s21, 2 }
  0x41   : > { %s1135_s27 = scalar_select %p27_p6, %s957_s20, %s29_s14  }
  0x42   : > { %p1129_p5 = por %p1269_p3, %p36_p13  ;;  %p38_p9 = por %p37_p10, %p36_p13 }
  0x43   : > { %s208_s30 = sand.u32 1, %s957_s20   ;;  %s655_s6 = sshll.u32 %s961_s21, 7 }
  0x44   : > { %s1270_s23 = scalar_select %p1129_p5, 1, 0 }
  0x45   : > { %s623_s7 = sshll.u32 %s208_s30, 3  ;;  %s1142_s10 = scalar_lea.hbm %s1256_s0, %s655_s6 }
  0x46   : > { %s212_s11 = scalar_lea.vmem [#allocation2], %s623_s7  ;;  %p1146_p11 = pnand %p744_p7, %p38_p9 }
  0x47   : > { %s219_s28 = sshll.u32 %s212_s11, 4  ;;  %s1150_s13 = scalar_lea.sflag [#allocation3], %s208_s30  ;;  %s1144_s28 = int_to_ptr.vmem [resolvable:$true] %s219_s28 }
  0x48   : > { %s861_s14 = scalar_lea.hbm %s1142_s10, 128  ;;  %p863_p0 = pneg %p1146_p11 }
  0x49   : > { %p862_p12 = scmp.ne.s32.totalorder %s1142_s10, %s861_s14  ;;  %s866_s6 = scalar_lea.hbm %s1256_s0, 256 }
  0x4a   : > { %p867_p13 = scmp.lt.u32.totalorder %s1142_s10, %s1256_s0  ;;  %p868_p6 = scmp.lt.u32.totalorder %s866_s6, %s861_s14 }
  0x4b   : > { %p864_p1 = pnand %p863_p0, %p862_p12  ;;  %p870_p3 = scmp.lt.u32.totalorder %s861_s14, %s1142_s10 }
  0x4c   : > { %p869_p10 = por %p868_p6, %p867_p13 }
  0x4d   : > { %p865_p2 = pneg %p864_p1 }
  0x4e   : > { %p871_p7 = por %p870_p3, %p869_p10 }
  0x50   : > { %p872_p9 = pnand %p871_p7, %p865_p2 }
  0x52   : > { %875 = shalt.err (!%p872_p9)
}
  0x53   : > { %s876_s30 = scalar_lea.vmem %s1144_s28, 128  ;;  %s967_s11 = smov [#allocation2]  }
  0x54   : > { %p877_p12 = scmp.ne.s32.totalorder %s1144_s28, %s876_s30  ;;  %s881_s17 = sshll.u32 %s967_s11, 4  ;;  %s882_s17 = int_to_ptr.vmem [resolvable:$false] %s881_s17 }
  0x55   : > { %s883_s7 = scalar_lea.vmem %s882_s17, 256  ;;  %p884_p4 = scmp.lt.s32.totalorder %s1144_s28, %s882_s17 }
  0x56   : > { %p879_p1 = pnand %p877_p12, %p863_p0  ;;  %p885_p13 = scmp.lt.s32.totalorder %s883_s7, %s876_s30 }
  0x58   : > { %p880_p5 = pneg %p879_p1  ;;  %p886_p6 = por %p885_p13, %p884_p4 }
  0x5a   : > { %p887_p10 = pnand %p886_p6, %p880_p5 }
  0x5c   : > { %890 = shalt.err (!%p887_p10)
}
  0x5d   : > { %737 = dma.hbm_to_vmem [thread:$0]  (!%p1146_p11), %s1142_s10, 128, %s1144_s28, %s1150_s13, %s965_s15, %s965_s15, %s966_s16  }
  0x5e   : > { %231 = sbr.rel (%p1043_p8) target bundleno = 590 (0x24e), region = 40  ;;  %s1184_s14 = sand.u32 (!%p1043_p8), 1, %s953_s19  }
  0x5f   : > { %s627_s6 = sshll.u32 (!%p1043_p8), %s1184_s14, 3  ;;  %s234_s8 = scalar_lea.sflag (!%p1043_p8), [#allocation3], %s1184_s14 }
  0x60   : > { %s1188_s9 = scalar_lea.vmem (!%p1043_p8), [#allocation2], %s627_s6  ;;  %p1272_p4 = scmp.ne.s32.totalorder (!%p1043_p8), %s1265_s24, 0 }
  0x65   : > { %936 = dma.done.wait (%p1272_p4), %s234_s8, 128  }
  0x66   : > { %938 = vsyncadd (%p1272_p4), %s234_s8, 4294967168  ;;  %p1273_p5 = scmp.eq.s32.totalorder %s1024_s22, 0 }
  0x68   : > { %940 = dma.done.wait (%p1273_p5), [#allocation6], 2048   ;;  %p1274_p8 = pmov %p1273_p5 }
  0x69   : > { %v968_v0 = vmov 0.0   ;;  %vm969_vm0 = vmmov 0   ;;  %v788_v1 = vld [vmem:[#allocation5] sm:$0xff]   ;;  %v789_v2 = vld [vmem:[#allocation5 + $0x8] sm:$0xff]   ;;  %v790_v3 = vld [vmem:[#allocation5 + $0x10] sm:$0xff]   ;;  %s630_s15 = sshll.u32 %s1184_s14, 4 }
  0x6a   : > { %942 = vsyncadd (%p1274_p8), [#allocation6], 4294965248  ;;  %675 = vmatprep.subr.bf16.mxu0 %v968_v0  ;;  %691 = vmatprep.mubr.msk.bf16.mxu0 %vm969_vm0, %v968_v0  ;;  %v797_v4 = vld [vmem:[#allocation7] sm:$0xff]   ;;  %v791_v5 = vld [vmem:[#allocation5 + $0x18] sm:$0xff]   ;;  %s271_s28 = scalar_lea.vmem [#allocation8], %s630_s15  ;;  %s656_s13 = sshll.u32 %s1024_s22, 8 }
  0x6b   : > { %695 = vmatprep.subr.bf16.mxu1 %v968_v0  ;;  %711 = vmatprep.mubr.msk.bf16.mxu1 %vm969_vm0, %v968_v0  ;;  %v798_v6 = vld [vmem:[#allocation7 + $0x8] sm:$0xff]   ;;  %v792_v7 = vld [vmem:[#allocation5 + $0x20] sm:$0xff]   ;;  %v799_v8 = vld [vmem:[#allocation7 + $0x10] sm:$0xff]   ;;  %s526_s12 = sshll.u32 %s271_s28, 4  ;;  %s1212_s17 = scalar_lea.hbm %s1261_s5, %s656_s13  ;;  %s1207_s12 = int_to_ptr.vmem [resolvable:$true] %s526_s12 }
  0x6c   : > { %676 = vmatpush3.bf16.msra.mxu0 %v788_v1  ;;  %696 = vmatpush3.bf16.msra.mxu1 %v797_v4  ;;  %v793_v9 = vld [vmem:[#allocation5 + $0x28] sm:$0xff]   ;;  %v800_v10 = vld [vmem:[#allocation7 + $0x18] sm:$0xff]   ;;  %v794_v11 = vld [vmem:[#allocation5 + $0x30] sm:$0xff]   ;;  %s513_s7 = scalar_lea.sflag [#allocation4], %s1184_s14  ;;  %s891_s22 = scalar_lea.vmem %s1207_s12, 256 }
  0x6d   : > { %677 = vmatprep.subr.bf16.mxu0 %v968_v0  ;;  %697 = vmatprep.subr.bf16.mxu1 %v968_v0  ;;  %v801_v12 = vld [vmem:[#allocation7 + $0x20] sm:$0xff]   ;;  %v795_v13 = vld [vmem:[#allocation5 + $0x38] sm:$0xff]   ;;  %v802_v14 = vld [vmem:[#allocation7 + $0x28] sm:$0xff]   ;;  %p892_p11 = scmp.ne.s32.totalorder %s1207_s12, %s891_s22  ;;  %p1275_p0 = scmp.ne.s32.totalorder %s1270_s23, 0 }
  0x6e   : > { %v796_v15 = vld [vmem:[%s1188_s9] sm:$0xff]   ;;  %s970_s6 = smov [#allocation8]  }
  0x6f   : > { %v803_v16 = vld [vmem:[#allocation7 + $0x30] sm:$0xff]   ;;  %v804_v17 = vld [vmem:[#allocation7 + $0x38] sm:$0xff]   ;;  %p893_p2 = pnand %p892_p11, %p1275_p0  ;;  %s895_s8 = sshll.u32 %s970_s6, 4  ;;  %s896_s8 = int_to_ptr.vmem [resolvable:$false] %s895_s8 }
  0x70   : > { %678 = vmatpush3.bf16.msra.mxu0 %v789_v2  ;;  %698 = vmatpush3.bf16.msra.mxu1 %v798_v6  ;;  %v631_v18 = vld [vmem:[%s1258_s2] ss:$0 sm:$0xff]  ;;  %s897_s9 = scalar_lea.vmem %s896_s8, 512  ;;  %p898_p7 = scmp.lt.s32.totalorder %s1207_s12, %s896_s8 }
  0x71   : > { %679 = vmatprep.subr.bf16.mxu0 %v968_v0  ;;  %699 = vmatprep.subr.bf16.mxu1 %v968_v0  ;;  %v641_v28 = vld [vmem:[%s1260_s4] ss:$0 sm:$0xff]  ;;  %p894_p3 = pneg %p893_p2  ;;  %p899_p9 = scmp.lt.s32.totalorder %s897_s9, %s891_s22 }
  0x73   : > { %p900_p12 = por %p899_p9, %p898_p7 }
  0x74   : > { %680 = vmatpush3.bf16.msra.mxu0 %v790_v3  ;;  %700 = vmatpush3.bf16.msra.mxu1 %v799_v8 }
  0x75   : > { %681 = vmatprep.subr.bf16.mxu0 %v968_v0  ;;  %701 = vmatprep.subr.bf16.mxu1 %v968_v0  ;;  %p901_p1 = pnand %p900_p12, %p894_p3 }
  0x78   : > { %682 = vmatpush3.bf16.msra.mxu0 %v791_v5  ;;  %702 = vmatpush3.bf16.msra.mxu1 %v800_v10 }
  0x79   : > { %683 = vmatprep.subr.bf16.mxu0 %v968_v0  ;;  %703 = vmatprep.subr.bf16.mxu1 %v968_v0 }
  0x7c   : > { %684 = vmatpush3.bf16.msra.mxu0 %v792_v7  ;;  %704 = vmatpush3.bf16.msra.mxu1 %v801_v12 }
  0x7d   : > { %685 = vmatprep.subr.bf16.mxu0 %v968_v0  ;;  %705 = vmatprep.subr.bf16.mxu1 %v968_v0 }
  0x80   : > { %686 = vmatpush3.bf16.msra.mxu0 %v793_v9  ;;  %706 = vmatpush3.bf16.msra.mxu1 %v802_v14 }
  0x81   : > { %687 = vmatprep.subr.bf16.mxu0 %v968_v0  ;;  %707 = vmatprep.subr.bf16.mxu1 %v968_v0 }
  0x84   : > { %688 = vmatpush3.bf16.msra.mxu0 %v794_v11  ;;  %708 = vmatpush3.bf16.msra.mxu1 %v803_v16 }
  0x85   : > { %689 = vmatprep.subr.bf16.mxu0 %v968_v0  ;;  %709 = vmatprep.subr.bf16.mxu1 %v968_v0 }
  0x88   : > { %690 = vmatpush3.bf16.msra.mxu0 %v795_v13  ;;  %710 = vmatpush3.bf16.msra.mxu1 %v804_v17 }
  0x8b   : > { %692 = vmatmul.mubr.bf16.vlgmr.msra.gmra.mrb[0].mxu0 %v796_v15 }
 0x15e   : > { %v388_v19 = vpop.f32.mrb[0].mxu0 }
 0x15f   : > { %v389_v20 = vadd.f32 %v631_v18, %v388_v19  ;;  %v693_v21 = vpop.f32.mrb[1].mxu0 }
 0x160   : > { %v391_v22 = vpop.f32.mrb[2].mxu0 }
 0x161   : > { %v392_v23 = vadd.f32 %v631_v18, %v391_v22  ;;  %v694_v24 = vpop.f32.mrb[3].mxu0  ;;  %v395_v25 = vmax.f32 %v389_v20, 0.0 }
 0x163   : > { %v396_v26 = vmax.f32 %v392_v23, 0.0 }
 0x165   : > { %v397_v27 = vpack.c.bf16 %v396_v26, %v395_v25 }
 0x167   : > { %712 = vmatmul.mubr.bf16.vlgmr.msra.gmra.mrb[0].mxu1 %v397_v27 }
 0x23a   : > { %v503_v29 = vpop.f32.mrb[0].mxu1 }
 0x23b   : > { %v504_v30 = vadd.f32 %v641_v28, %v503_v29  ;;  %v713_v31 = vpop.f32.mrb[1].mxu1 }
 0x23c   : > { %v506_v32 = vpop.f32.mrb[2].mxu1 }
 0x23d   : > { %510 = vst [vmem:[%s271_s28] sm:$0xff] %v504_v30  ;;  %v507_v33 = vadd.f32 %v641_v28, %v506_v32  ;;  %v714_v34 = vpop.f32.mrb[3].mxu1 }
 0x23f   : > { %511 = vst [vmem:[%s271_s28 + $0x8] sm:$0xff] %v507_v33 }
 0x240   : > { %904 = shalt.err (!%p901_p1)
}
 0x241   : > { %s905_s24 = scalar_lea.hbm %s1212_s17, 256  ;;  %s909_s16 = scalar_lea.hbm %s1261_s5, 512 }
 0x242   : > { %p906_p13 = scmp.ne.s32.totalorder %s1212_s17, %s905_s24  ;;  %p910_p4 = scmp.lt.u32.totalorder %s1212_s17, %s1261_s5 }
 0x243   : > { %p911_p5 = scmp.lt.u32.totalorder %s909_s16, %s905_s24  ;;  %p913_p11 = scmp.lt.u32.totalorder %s905_s24, %s1212_s17 }
 0x244   : > { %p907_p6 = pnand %p906_p13, %p1275_p0 }
 0x245   : > { %p912_p8 = por %p911_p5, %p910_p4 }
 0x246   : > { %p908_p10 = pneg %p907_p6 }
 0x247   : > { %p914_p2 = por %p913_p11, %p912_p8 }
 0x249   : > { %p915_p3 = pnand %p914_p2, %p908_p10 }
 0x24b   : > { %918 = shalt.err (!%p915_p3)
}
 0x24c   : > { %s971_s13 = smov 128   ;;  %s972_s30 = smov 8  }
 0x24d   : > { %725 = dma.vmem_to_hbm [thread:$0]  (%p1275_p0), %s1207_s12, 256, %s1212_s17, %s513_s7, %s971_s13, %s971_s13, %s972_s30  }
 0x24e PF: > { %s541_s11 = sand.u32 1, %s949_s18   ;;  %p1276_p7 = scmp.ne.s32.totalorder %s1266_s25, 0 }
 0x24f   : > { %p1277_p9 = scmp.ge.s32.totalorder %s961_s21, 2  ;;  %s542_s22 = scalar_lea.sflag [#allocation4], %s541_s11 }
 0x251   : > { %p739_p12 = pnand %p1277_p9, %p1276_p7 }
 0x253   : > { %944 = dma.done.wait (!%p739_p12), %s542_s22, 256  }
 0x254   : > { %946 = vsyncadd (!%p739_p12), %s542_s22, 4294967040  ;;  %p19_p1 = scmp.ge.s32.totalorder %s1119_s29, 4   ;;  %s1278_s18 = smov %s953_s19 }
 0x255   : > { %s1279_s19 = smov %s957_s20  ;;  %s1280_s20 = smov %s1135_s27 }
 0x256   : > { %s1281_s21 = smov %s1119_s29  ;;  %21 = sbr.rel (!%p19_p1) target bundleno = 6 (0x6), region = 93 }
 0x25d   :  { %547 = vsyncpa [#allocation3], 1 }
 0x25e   :  { %549 = vsyncpa [#allocation3 + $0x1], 1 }
 0x25f   :  { %550 = vsyncpa [#allocation6], 1 }
 0x260   :  { %551 = vsyncpa [#allocation4], 1 }
 0x261   :  { %553 = vsyncpa [#allocation4 + $0x1], 1 }

</bundles_post_ra>
